<compile_context>
chip_gen: v5e
topology: v5e:2x2
jax: 0.10.0
libtpu: 0.0.40
codegen_flags: <defaults>
</compile_context>

<pallas_src>
import jax
import jax.numpy as jnp
from jax.experimental import pallas as pl
from jax.experimental.pallas import tpu as pltpu


def _linear_kernel(x_ref, w_ref, b_ref, o_ref):
    # x_ref: (TB, D) VMEM  -- streamed batch tile (auto double-buffered)
    # w_ref: (1, D)  VMEM  -- resident weight row (constant index_map)
    # b_ref: (1,)    SMEM  -- scalar bias
    # o_ref: (TB, 1) VMEM  -- per-row result column
    x = x_ref[...].astype(jnp.float32)
    w = w_ref[...].astype(jnp.float32)          # (1, D) sublane-broadcasts over (TB, D)
    prod = x * w                                # VPU elementwise
    row_sum = jnp.sum(prod, axis=1, keepdims=True)   # XLU lane reduction -> (TB, 1)
    o_ref[...] = (row_sum + b_ref[0]).astype(o_ref.dtype)


def _round_up(n, m):
    return ((n + m - 1) // m) * m


def linear_regression(x, w, b, *, block_rows=2048):
    """y = x @ w.T + b, with w in PyTorch nn.Linear layout (1, 768), b shape (1,)."""
    B, D = x.shape
    assert w.shape == (1, D)
    assert b.shape == (1,)

    # Batch tile: multiple of 128 (lane/sublane friendly), capped at block_rows
    # (<= 2048 keeps the double-buffered f32 x tiles comfortably inside the
    # default scoped-VMEM limit on v5e/v6e/v7x).
    tb = min(block_rows, _round_up(B, 128))
    tb = _round_up(tb, 128)
    rows_padded = _round_up(B, tb)
    if rows_padded != B:
        x = jnp.pad(x, ((0, rows_padded - B), (0, 0)))
    grid = (rows_padded // tb,)

    out = pl.pallas_call(
        _linear_kernel,
        out_shape=jax.ShapeDtypeStruct((rows_padded, 1), x.dtype),
        grid_spec=pltpu.PrefetchScalarGridSpec(
            num_scalar_prefetch=0,
            grid=grid,
            in_specs=[
                # x: one (tb, D) tile per grid step -> pipelined HBM stream.
                pl.BlockSpec((tb, D), lambda i: (i, 0)),
                # w: constant block index -> DMA'd once, resident in VMEM.
                pl.BlockSpec((1, D), lambda i: (0, 0)),
                # bias: scalar, lives in SMEM (no padded (8,128) VMEM tile).
                pl.BlockSpec(memory_space=pltpu.MemorySpace.SMEM),
            ],
            out_specs=pl.BlockSpec((tb, 1), lambda i: (i, 0)),
        ),
        compiler_params=pltpu.CompilerParams(
            # Batch tiles are independent -> shard across v7x's 2 TensorCores.
            dimension_semantics=("parallel",),
        ),
    )(x, w, b)
    return out[:B]


if __name__ == "__main__":
    key = jax.random.PRNGKey(0)
    k_x, k_w, k_b = jax.random.split(key, 3)

    batch, hidden = 8, 768  # in_features is fixed at 768 by the module spec
    x = jax.random.normal(k_x, (batch, hidden), dtype=jnp.float32)

    # Parameters in nn.Linear(768, 1) layout: weight (out=1, in=768), bias (1,).
    w = jax.random.normal(k_w, (1, hidden), dtype=jnp.float32) * 0.02
    b = jax.random.normal(k_b, (1,), dtype=jnp.float32) * 0.02

    out = linear_regression(x, w, b)
    jax.block_until_ready(out)

    ref = jnp.dot(x, w.T, precision=jax.lax.Precision.HIGHEST) + b[None, :]
    assert out.shape == (batch, 1)
    assert jnp.allclose(out, ref, atol=1e-4, rtol=1e-4), float(jnp.max(jnp.abs(out - ref)))

    print("KERNEL_OK")
</pallas_src>

<mosaic_0001>
module attributes {stable_mosaic.version = 11 : i64} {
  func.func @_linear_kernel(%arg0: i32, %arg1: memref<128x768xf32, #tpu.memory_space<vmem>>, %arg2: memref<1x768xf32, #tpu.memory_space<vmem>>, %arg3: memref<1xf32, #tpu.memory_space<smem>>, %arg4: memref<128x1xf32, #tpu.memory_space<vmem>>) attributes {dimension_semantics = [#tpu.dimension_semantics<parallel>], iteration_bounds = array<i64: 1>, scalar_prefetch = 0 : i64, scratch_operands = 0 : i64, tpu.core_type = #tpu.core_type<tc>, window_params = [{transform_indices = @transform_0, window_bounds = array<i64: 128, 768>}, {pipeline_mode = #tpu.pipeline_mode<synchronous>, transform_indices = @transform_1, window_bounds = array<i64: 1, 768>}, {transform_indices = @transform_2, window_bounds = array<i64: 1>}, {transform_indices = @transform_3, window_bounds = array<i64: 128, 1>}]} {
    %c0 = arith.constant 0 : index
    %c0_0 = arith.constant 0 : index
    %0 = vector.load %arg1[%c0, %c0_0] : memref<128x768xf32, #tpu.memory_space<vmem>>, vector<128x768xf32>
    %c0_1 = arith.constant 0 : index
    %c0_2 = arith.constant 0 : index
    %1 = vector.load %arg2[%c0_1, %c0_2] : memref<1x768xf32, #tpu.memory_space<vmem>>, vector<1x768xf32>
    %2 = vector.broadcast %1 : vector<1x768xf32> to vector<128x768xf32>
    %3 = arith.mulf %0, %2 : vector<128x768xf32>
    %cst = arith.constant dense<0.000000e+00> : vector<128xf32>
    %4 = vector.multi_reduction <add>, %3, %cst [1] : vector<128x768xf32> to vector<128xf32>
    %5 = vector.shape_cast %4 : vector<128xf32> to vector<128x1xf32>
    %c0_3 = arith.constant 0 : index
    %6 = memref.load %arg3[%c0_3] : memref<1xf32, #tpu.memory_space<smem>>
    %7 = vector.broadcast %6 : f32 to vector<128x1xf32>
    %8 = arith.addf %5, %7 : vector<128x1xf32>
    %c0_4 = arith.constant 0 : index
    %c0_5 = arith.constant 0 : index
    %9 = vector.load %arg4[%c0_4, %c0_5] : memref<128x1xf32, #tpu.memory_space<vmem>>, vector<128x1xf32>
    tpu.vector_store %arg4[%c0_4, %c0_5], %8 {strides = array<i32>} : memref<128x1xf32, #tpu.memory_space<vmem>>, vector<128x1xf32>,
    return
  }
  func.func @transform_0(%arg0: i32) -> (i32, i32) {
    %c0_i32 = arith.constant 0 : i32
    %c0_i32_0 = arith.constant 0 : i32
    return %arg0, %c0_i32 : i32, i32
  }
  func.func @transform_1(%arg0: i32) -> (i32, i32) {
    %c0_i32 = arith.constant 0 : i32
    %c0_i32_0 = arith.constant 0 : i32
    %c0_i32_1 = arith.constant 0 : i32
    return %c0_i32, %c0_i32_0 : i32, i32
  }
  func.func @transform_2(%arg0: i32) -> i32 {
    %c0_i32 = arith.constant 0 : i32
    %c0_i32_0 = arith.constant 0 : i32
    return %c0_i32 : i32
  }
  func.func @transform_3(%arg0: i32) -> (i32, i32) {
    %c0_i32 = arith.constant 0 : i32
    %c0_i32_0 = arith.constant 0 : i32
    return %arg0, %c0_i32 : i32, i32
  }
}

</mosaic_0001>

<bundles_post_ra>
// kernel: tpu_custom_call.1
= control target key start
LH: loop header
LB: loop body
LE: loop exit
PB: predicated region body
PF: predicated region fallthrough
CT: control target
= control target key end

     0   :  { %9 = vsyncpa [#allocation4], 0  ;;  %s665_s0 = inlined_call_operand.hbm [shape: f32[128,768], index: 0, kind: input, shape index: {}]   ;;  %s666_s1 = inlined_call_operand.hbm [shape: f32[1,768], index: 1, kind: input, shape index: {}]   ;;  %s667_s2 = inlined_call_operand.<no memory space> [shape: f32[1], index: 2, kind: input, shape index: {}]   ;;  %s668_s3 = inlined_call_operand.vmem [shape: f32[128,1], index: 3, kind: output, shape index: {}]  }
   0x1   :  { %s15_s14 = sshll.u32 %s665_s0, 4  ;;  %s16_s14 = int_to_ptr.hbm [resolvable:$true] %s15_s14 }
   0x2   :  { %10 = vsyncpa [#allocation6], 0  ;;  %s460_s15 = smov [#allocation3]   ;;  %s29_s19 = sshll.u32 %s666_s1, 4  ;;  %s30_s19 = int_to_ptr.hbm [resolvable:$true] %s29_s19 }
   0x3   :  { %s17_s16 = sshll.u32 %s460_s15, 4  ;;  %s461_s20 = smov 768   ;;  %s18_s16 = int_to_ptr.vmem [resolvable:$true] %s17_s16 }
   0x4   :  { %s462_s21 = smov 48   ;;  %s463_s22 = smov [#allocation5]  }
   0x5   :  { %23 = dma.hbm_to_vmem [thread:$0]  %s16_s14, 12288, %s18_s16, [#allocation4], %s461_s20, %s461_s20, %s462_s21  }
   0x6   :  { %s31_s23 = sshll.u32 %s463_s22, 4  ;;  %s32_s23 = int_to_ptr.vmem [resolvable:$true] %s31_s23 }
   0x7   :  { %34 = dma.hbm_to_vmem [thread:$0]  %s30_s19, 96, %s32_s23, [#allocation6]  }
   0x8   :  { %456 = dma.done.wait [#allocation4], 12288  }
   0x9   :  { %457 = vsyncadd [#allocation4], 4294955008 }
   0xa   :  { %458 = dma.done.wait [#allocation6], 96  }
   0xb   :  { %459 = vsyncadd [#allocation6], 4294967200  ;;  %v45_v0 = vld [vmem:[#allocation3] sm:$0xff]  ;;  %v46_v1 = vld [vmem:[#allocation3 + $0x8] sm:$0xff]  ;;  %vm381_vm0 = vcmask 7168  }
   0xc   :  { %v47_v2 = vld [vmem:[#allocation3 + $0x10] sm:$0xff]  ;;  %v48_v3 = vld [vmem:[#allocation3 + $0x18] sm:$0xff]  ;;  %v141_v4 = vld [vmem:[#allocation5] sm:$0x3f] }
   0xd   :  { %v490_v5 = vperm.slane %v141_v4, 0  ;;  %v492_v6 = vperm.slane %v141_v4, 1  ;;  %v494_v7 = vperm.slane %v141_v4, 2  ;;  %v496_v8 = vperm.slane %v141_v4, 3  ;;  %v69_v9 = vld [vmem:[#allocation3 + $0xc0] sm:$0xff]  ;;  %v70_v10 = vld [vmem:[#allocation3 + $0xc8] sm:$0xff] }
   0xe   :  { %v49_v11 = vld [vmem:[#allocation3 + $0x20] sm:$0xff]  ;;  %v50_v12 = vld [vmem:[#allocation3 + $0x28] sm:$0xff]  ;;  %v498_v13 = vperm.slane %v141_v4, 4  ;;  %v500_v14 = vperm.slane %v141_v4, 5  ;;  %v71_v15 = vld [vmem:[#allocation3 + $0xd0] sm:$0xff] }
   0xf   :  { %v155_v16 = vmul.f32 %v490_v5, %v45_v0  ;;  %v156_v17 = vmul.f32 %v492_v6, %v46_v1  ;;  %v157_v18 = vmul.f32 %v494_v7, %v47_v2  ;;  %v72_v19 = vld [vmem:[#allocation3 + $0xd8] sm:$0xff]  ;;  %v57_v20 = vld [vmem:[#allocation3 + $0x60] sm:$0xff]  ;;  %v58_v21 = vld [vmem:[#allocation3 + $0x68] sm:$0xff]  ;;  %v158_v22 = vmul.f32 %v496_v8, %v48_v3 }
  0x10   :  { %v73_v23 = vld [vmem:[#allocation3 + $0xe0] sm:$0xff]  ;;  %v74_v24 = vld [vmem:[#allocation3 + $0xe8] sm:$0xff]  ;;  %v179_v25 = vmul.f32 %v490_v5, %v69_v9  ;;  %v180_v26 = vmul.f32 %v492_v6, %v70_v10  ;;  %v59_v27 = vld [vmem:[#allocation3 + $0x70] sm:$0xff]  ;;  %v159_v28 = vmul.f32 %v498_v13, %v49_v11  ;;  %v160_v29 = vmul.f32 %v500_v14, %v50_v12 }
  0x11   :  { %v251_v30 = vadd.f32 %v156_v17, %v155_v16  ;;  %v181_v31 = vmul.f32 %v494_v7, %v71_v15  ;;  %v60_v32 = vld [vmem:[#allocation3 + $0x78] sm:$0xff]  ;;  %v51_v33 = vld [vmem:[#allocation3 + $0x30] sm:$0xff]  ;;  %v182_v34 = vmul.f32 %v496_v8, %v72_v19  ;;  %v61_v36 = vld [vmem:[#allocation3 + $0x80] sm:$0xff]  ;;  %v167_v37 = vmul.f32 %v490_v5, %v57_v20 }
  0x12   :  { %v279_v35 = vadd.f32 %v180_v26, %v179_v25  ;;  %v168_v38 = vmul.f32 %v492_v6, %v58_v21  ;;  %v52_v39 = vld [vmem:[#allocation3 + $0x38] sm:$0xff]  ;;  %v53_v40 = vld [vmem:[#allocation3 + $0x40] sm:$0xff]  ;;  %v183_v42 = vmul.f32 %v498_v13, %v73_v23  ;;  %v184_v43 = vmul.f32 %v500_v14, %v74_v24  ;;  %v62_v44 = vld [vmem:[#allocation3 + $0x88] sm:$0xff] }
  0x13   :  { %v252_v41 = vadd.f32 %v251_v30, %v157_v18  ;;  %v169_v45 = vmul.f32 %v494_v7, %v59_v27  ;;  %v54_v46 = vld [vmem:[#allocation3 + $0x48] sm:$0xff]  ;;  %v170_v48 = vmul.f32 %v496_v8, %v60_v32  ;;  %v161_v50 = vmul.f32 %v490_v5, %v51_v33  ;;  %v75_v51 = vld [vmem:[#allocation3 + $0xf0] sm:$0xff]  ;;  %v76_v52 = vld [vmem:[#allocation3 + $0xf8] sm:$0xff] }
  0x14   :  { %v280_v47 = vadd.f32 %v279_v35, %v181_v31  ;;  %v265_v49 = vadd.f32 %v168_v38, %v167_v37  ;;  %v171_v54 = vmul.f32 %v498_v13, %v61_v36  ;;  %v55_v55 = vld [vmem:[#allocation3 + $0x50] sm:$0xff]  ;;  %v162_v56 = vmul.f32 %v492_v6, %v52_v39  ;;  %v77_v58 = vld [vmem:[#allocation3 + $0x100] sm:$0xff]  ;;  %v56_v62 = vld [vmem:[#allocation3 + $0x58] sm:$0xff] }
  0x15   :  { %v253_v53 = vadd.f32 %v252_v41, %v158_v22  ;;  %v163_v57 = vmul.f32 %v494_v7, %v53_v40  ;;  %v172_v60 = vmul.f32 %v500_v14, %v62_v44  ;;  %v164_v63 = vmul.f32 %v496_v8, %v54_v46  ;;  %v78_v0 = vld [vmem:[#allocation3 + $0x108] sm:$0xff]  ;;  %v63_v9 = vld [vmem:[#allocation3 + $0x90] sm:$0xff]  ;;  %v64_v17 = vld [vmem:[#allocation3 + $0x98] sm:$0xff] }
  0x16   :  { %v281_v59 = vadd.f32 %v280_v47, %v182_v34  ;;  %v266_v61 = vadd.f32 %v265_v49, %v169_v45  ;;  %v258_v2 = vadd.f32 %v162_v56, %v161_v50  ;;  %v185_v3 = vmul.f32 %v490_v5, %v75_v51  ;;  %v79_v15 = vld [vmem:[#allocation3 + $0x110] sm:$0xff]  ;;  %v65_v18 = vld [vmem:[#allocation3 + $0xa0] sm:$0xff]  ;;  %v80_v22 = vld [vmem:[#allocation3 + $0x118] sm:$0xff] }
  0x17   :  { %v254_v1 = vadd.f32 %v253_v53, %v159_v28  ;;  %v186_v4 = vmul.f32 %v492_v6, %v76_v52  ;;  %v165_v12 = vmul.f32 %v498_v13, %v55_v55  ;;  %v187_v16 = vmul.f32 %v494_v7, %v77_v58  ;;  %v66_v24 = vld [vmem:[#allocation3 + $0xa8] sm:$0xff]  ;;  %v81_v30 = vld [vmem:[#allocation3 + $0x120] sm:$0xff]  ;;  %v67_v34 = vld [vmem:[#allocation3 + $0xb0] sm:$0xff] }
  0x18   :  { %v282_v10 = vadd.f32 %v281_v59, %v183_v42  ;;  %v267_v11 = vadd.f32 %v266_v61, %v170_v48  ;;  %v166_v20 = vmul.f32 %v500_v14, %v56_v62  ;;  %v259_v21 = vadd.f32 %v258_v2, %v163_v57  ;;  %v82_v31 = vld [vmem:[#allocation3 + $0x128] sm:$0xff]  ;;  %v83_v37 = vld [vmem:[#allocation3 + $0x130] sm:$0xff]  ;;  %v84_v42 = vld [vmem:[#allocation3 + $0x138] sm:$0xff] }
  0x19   :  { %v255_v19 = vadd.f32 %v254_v1, %v160_v29  ;;  %v188_v23 = vmul.f32 %v496_v8, %v78_v0  ;;  %v286_v27 = vadd.f32 %v186_v4, %v185_v3  ;;  %v173_v28 = vmul.f32 %v490_v5, %v63_v9  ;;  %v68_v29 = vld [vmem:[#allocation3 + $0xb8] sm:$0xff]  ;;  %v93_v47 = vld [vmem:[#allocation3 + $0x180] sm:$0xff]  ;;  %v94_v48 = vld [vmem:[#allocation3 + $0x188] sm:$0xff] }
  0x1a   :  { %v283_v25 = vadd.f32 %v282_v10, %v184_v43  ;;  %v268_v26 = vadd.f32 %v267_v11, %v171_v54  ;;  %v260_v32 = vadd.f32 %v259_v21, %v164_v63  ;;  %v189_v33 = vmul.f32 %v498_v13, %v79_v15  ;;  %v95_v49 = vld [vmem:[#allocation3 + $0x190] sm:$0xff]  ;;  %v85_v53 = vld [vmem:[#allocation3 + $0x140] sm:$0xff]  ;;  %v86_v54 = vld [vmem:[#allocation3 + $0x148] sm:$0xff] }
  0x1b   :  { %256 = vadd.xlane.f32.xlu0 %v255_v19  ;;  %v174_v35 = vmul.f32 %v492_v6, %v64_v17  ;;  %v175_v36 = vmul.f32 %v494_v7, %v65_v18  ;;  %v190_v39 = vmul.f32 %v500_v14, %v80_v22  ;;  %v287_v40 = vadd.f32 %v286_v27, %v187_v16  ;;  %v87_v61 = vld [vmem:[#allocation3 + $0x150] sm:$0xff]  ;;  %v88_v2 = vld [vmem:[#allocation3 + $0x158] sm:$0xff]  ;;  %v89_v3 = vld [vmem:[#allocation3 + $0x160] sm:$0xff] }
  0x1c   :  { %284 = vadd.xlane.f32.xlu2 %v283_v25  ;;  %v269_v38 = vadd.f32 %v268_v26, %v172_v60  ;;  %v176_v41 = vmul.f32 %v496_v8, %v66_v24  ;;  %v261_v43 = vadd.f32 %v260_v32, %v165_v12  ;;  %v191_v45 = vmul.f32 %v490_v5, %v81_v30  ;;  %v96_v60 = vld [vmem:[#allocation3 + $0x198] sm:$0xff]  ;;  %v97_v12 = vld [vmem:[#allocation3 + $0x1a0] sm:$0xff]  ;;  %v98_v15 = vld [vmem:[#allocation3 + $0x1a8] sm:$0xff] }
  0x1d   :  { %v272_v44 = vadd.f32 %v174_v35, %v173_v28  ;;  %v192_v46 = vmul.f32 %v492_v6, %v82_v31  ;;  %v288_v50 = vadd.f32 %v287_v40, %v188_v23  ;;  %v177_v51 = vmul.f32 %v498_v13, %v67_v34  ;;  %v90_v16 = vld [vmem:[#allocation3 + $0x168] sm:$0xff]  ;;  %v99_v21 = vld [vmem:[#allocation3 + $0x1b0] sm:$0xff]  ;;  %v100_v27 = vld [vmem:[#allocation3 + $0x1b8] sm:$0xff] }
  0x1e   :  { %270 = vadd.xlane.f32.xlu1 %v269_v38  ;;  %v178_v52 = vmul.f32 %v500_v14, %v68_v29  ;;  %v193_v55 = vmul.f32 %v494_v7, %v83_v37  ;;  %v262_v56 = vadd.f32 %v261_v43, %v166_v20  ;;  %v194_v58 = vmul.f32 %v496_v8, %v84_v42  ;;  %v91_v24 = vld [vmem:[#allocation3 + $0x170] sm:$0xff]  ;;  %v101_v28 = vld [vmem:[#allocation3 + $0x1c0] sm:$0xff]  ;;  %v102_v29 = vld [vmem:[#allocation3 + $0x1c8] sm:$0xff] }
  0x1f   :  { %v273_v57 = vadd.f32 %v272_v44, %v175_v36  ;;  %v293_v59 = vadd.f32 %v192_v46, %v191_v45  ;;  %v289_v62 = vadd.f32 %v288_v50, %v189_v33  ;;  %v203_v63 = vmul.f32 %v490_v5, %v93_v47  ;;  %v92_v33 = vld [vmem:[#allocation3 + $0x178] sm:$0xff]  ;;  %v103_v43 = vld [vmem:[#allocation3 + $0x1d0] sm:$0xff]  ;;  %v113_v47 = vld [vmem:[#allocation3 + $0x220] sm:$0xff] }
  0x20   :  { %v204_v0 = vmul.f32 %v492_v6, %v94_v48  ;;  %v205_v1 = vmul.f32 %v494_v7, %v95_v49  ;;  %v195_v9 = vmul.f32 %v498_v13, %v85_v53  ;;  %v196_v10 = vmul.f32 %v500_v14, %v86_v54  ;;  %v112_v40 = vld [vmem:[#allocation3 + $0x218] sm:$0xff] }
  0x21   :  { %v274_v4 = vadd.f32 %v273_v57, %v176_v41  ;;  %v294_v11 = vadd.f32 %v293_v59, %v193_v55  ;;  %v290_v17 = vadd.f32 %v289_v62, %v190_v39  ;;  %v206_v18 = vmul.f32 %v496_v8, %v96_v60  ;;  %v111_v39 = vld [vmem:[#allocation3 + $0x210] sm:$0xff]  ;;  %v104_v44 = vld [vmem:[#allocation3 + $0x1d8] sm:$0xff]  ;;  %v105_v57 = vld [vmem:[#allocation3 + $0x1e0] sm:$0xff] }
  0x22   :  { %v307_v19 = vadd.f32 %v204_v0, %v203_v63  ;;  %v197_v20 = vmul.f32 %v490_v5, %v87_v61  ;;  %v198_v25 = vmul.f32 %v492_v6, %v88_v2  ;;  %v199_v26 = vmul.f32 %v494_v7, %v89_v3  ;;  %v107_v59 = vld [vmem:[#allocation3 + $0x1f0] sm:$0xff]  ;;  %v116_v0 = vld [vmem:[#allocation3 + $0x238] sm:$0xff] }
  0x23   :  { %263 = vadd.xlane.f32.xlu0 %v262_v56  ;;  %v275_v22 = vadd.f32 %v274_v4, %v177_v51  ;;  %v295_v23 = vadd.f32 %v294_v11, %v194_v58  ;;  %v207_v30 = vmul.f32 %v498_v13, %v97_v12  ;;  %v208_v31 = vmul.f32 %v500_v14, %v98_v15  ;;  %v106_v58 = vld [vmem:[#allocation3 + $0x1e8] sm:$0xff]  ;;  %v115_v63 = vld [vmem:[#allocation3 + $0x230] sm:$0xff]  ;;  %v117_v11 = vld [vmem:[#allocation3 + $0x240] sm:$0xff] }
  0x24   :  { %291 = vadd.xlane.f32.xlu2 %v290_v17  ;;  %v308_v32 = vadd.f32 %v307_v19, %v205_v1  ;;  %v200_v34 = vmul.f32 %v496_v8, %v90_v16  ;;  %v300_v37 = vadd.f32 %v198_v25, %v197_v20  ;;  %v209_v38 = vmul.f32 %v490_v5, %v99_v21  ;;  %v119_v19 = vld [vmem:[#allocation3 + $0x250] sm:$0xff]  ;;  %v120_v25 = vld [vmem:[#allocation3 + $0x258] sm:$0xff] }
  0x25   :  { %v276_v35 = vadd.f32 %v275_v22, %v178_v52  ;;  %v296_v36 = vadd.f32 %v295_v23, %v195_v9  ;;  %v201_v42 = vmul.f32 %v498_v13, %v91_v24  ;;  %v210_v45 = vmul.f32 %v492_v6, %v100_v27  ;;  %v114_v52 = vld [vmem:[#allocation3 + $0x228] sm:$0xff]  ;;  %v109_v24 = vld [vmem:[#allocation3 + $0x200] sm:$0xff] }
  0x26   :  { %v309_v41 = vadd.f32 %v308_v32, %v206_v18  ;;  %v211_v46 = vmul.f32 %v494_v7, %v101_v28  ;;  %v202_v49 = vmul.f32 %v500_v14, %v92_v33  ;;  %v301_v50 = vadd.f32 %v300_v37, %v199_v26  ;;  %v118_v18 = vld [vmem:[#allocation3 + $0x248] sm:$0xff]  ;;  %v131_v37 = vld [vmem:[#allocation3 + $0x2b0] sm:$0xff] }
  0x27   :  { %277 = vadd.xlane.f32.xlu1 %v276_v35  ;;  %v297_v48 = vadd.f32 %v296_v36, %v196_v10  ;;  %v212_v51 = vmul.f32 %v496_v8, %v102_v29  ;;  %v314_v54 = vadd.f32 %v210_v45, %v209_v38  ;;  %v221_v55 = vmul.f32 %v490_v5, %v111_v39  ;;  %v108_v10 = vld [vmem:[#allocation3 + $0x1f8] sm:$0xff]  ;;  %v130_v36 = vld [vmem:[#allocation3 + $0x2a8] sm:$0xff] }
  0x28   :  { %v310_v53 = vadd.f32 %v309_v41, %v207_v30  ;;  %v222_v56 = vmul.f32 %v492_v6, %v112_v40  ;;  %v302_v60 = vadd.f32 %v301_v50, %v200_v34  ;;  %v213_v61 = vmul.f32 %v498_v13, %v103_v43  ;;  %v110_v34 = vld [vmem:[#allocation3 + $0x208] sm:$0xff]  ;;  %v121_v40 = vld [vmem:[#allocation3 + $0x260] sm:$0xff] }
  0x29   :  { %v214_v62 = vmul.f32 %v500_v14, %v104_v44  ;;  %v223_v1 = vmul.f32 %v494_v7, %v113_v47  ;;  %v315_v3 = vadd.f32 %v314_v54, %v211_v46  ;;  %v224_v4 = vmul.f32 %v496_v8, %v114_v52  ;;  %v123_v47 = vld [vmem:[#allocation3 + $0x270] sm:$0xff]  ;;  %v133_v52 = vld [vmem:[#allocation3 + $0x2c0] sm:$0xff] }
  0x2a   :  { %v311_v2 = vadd.f32 %v310_v53, %v208_v31  ;;  %v328_v9 = vadd.f32 %v222_v56, %v221_v55  ;;  %v303_v12 = vadd.f32 %v302_v60, %v201_v42  ;;  %v215_v15 = vmul.f32 %v490_v5, %v105_v57  ;;  %v129_v31 = vld [vmem:[#allocation3 + $0x2a0] sm:$0xff]  ;;  %v132_v42 = vld [vmem:[#allocation3 + $0x2b8] sm:$0xff]  ;;  %v126_v60 = vld [vmem:[#allocation3 + $0x288] sm:$0xff] }
  0x2b   :  { %298 = vadd.xlane.f32.xlu0 %v297_v48  ;;  %v216_v16 = vmul.f32 %v492_v6, %v106_v58  ;;  %v217_v17 = vmul.f32 %v494_v7, %v107_v59  ;;  %v316_v20 = vadd.f32 %v315_v3, %v212_v51  ;;  %v225_v21 = vmul.f32 %v498_v13, %v115_v63  ;;  %v124_v48 = vld [vmem:[#allocation3 + $0x278] sm:$0xff]  ;;  %v122_v51 = vld [vmem:[#allocation3 + $0x268] sm:$0xff]  ;;  %v125_v55 = vld [vmem:[#allocation3 + $0x280] sm:$0xff] }
  0x2c   :  { %312 = vadd.xlane.f32.xlu2 %v311_v2  ;;  %v226_v22 = vmul.f32 %v500_v14, %v116_v0  ;;  %v329_v23 = vadd.f32 %v328_v9, %v223_v1  ;;  %v304_v26 = vadd.f32 %v303_v12, %v202_v49  ;;  %v218_v27 = vmul.f32 %v496_v8, %v108_v10  ;;  %v135_v1 = vld [vmem:[#allocation3 + $0x2d0] sm:$0xff]  ;;  %v136_v2 = vld [vmem:[#allocation3 + $0x2d8] sm:$0xff]  ;;  %v137_v3 = vld [vmem:[#allocation3 + $0x2e0] sm:$0xff] }
  0x2d   :  { %v321_v28 = vadd.f32 %v216_v16, %v215_v15  ;;  %v227_v30 = vmul.f32 %v490_v5, %v117_v11  ;;  %v317_v32 = vadd.f32 %v316_v20, %v213_v61  ;;  %v228_v29 = vmul.f32 %v492_v6, %v118_v18  ;;  %v134_v10 = vld [vmem:[#allocation3 + $0x2c8] sm:$0xff]  ;;  %v127_v12 = vld [vmem:[#allocation3 + $0x290] sm:$0xff] }
  0x2e   :  { %v330_v33 = vadd.f32 %v329_v23, %v224_v4  ;;  %v229_v35 = vmul.f32 %v494_v7, %v119_v19  ;;  %v219_v38 = vmul.f32 %v498_v13, %v109_v24  ;;  %v230_v41 = vmul.f32 %v496_v8, %v120_v25  ;;  %v138_v20 = vld [vmem:[#allocation3 + $0x2e8] sm:$0xff] }
  0x2f   :  { %305 = vadd.xlane.f32.xlu1 %v304_v26  ;;  %v322_v39 = vadd.f32 %v321_v28, %v217_v17  ;;  %v318_v43 = vadd.f32 %v317_v32, %v214_v62  ;;  %v335_v45 = vadd.f32 %v228_v29, %v227_v30  ;;  %v239_v46 = vmul.f32 %v490_v5, %v129_v31  ;;  %v139_v31 = vld [vmem:[#allocation3 + $0x2f0] sm:$0xff] }
  0x30   :  { %v331_v44 = vadd.f32 %v330_v33, %v225_v21  ;;  %v220_v49 = vmul.f32 %v500_v14, %v110_v34  ;;  %v240_v53 = vmul.f32 %v492_v6, %v130_v36  ;;  %v241_v54 = vmul.f32 %v494_v7, %v131_v37  ;;  %v140_v36 = vld [vmem:[#allocation3 + $0x2f8] sm:$0xff] }
  0x31   :  { %v323_v50 = vadd.f32 %v322_v39, %v218_v27  ;;  %v231_v57 = vmul.f32 %v498_v13, %v121_v40  ;;  %v336_v58 = vadd.f32 %v335_v45, %v229_v35  ;;  %v242_v59 = vmul.f32 %v496_v8, %v132_v42 }
  0x32   :  { %v332_v56 = vadd.f32 %v331_v44, %v226_v22  ;;  %v349_v62 = vadd.f32 %v240_v53, %v239_v46  ;;  %v233_v63 = vmul.f32 %v490_v5, %v123_v47  ;;  %v234_v0 = vmul.f32 %v492_v6, %v124_v48  ;;  %v128_v22 = vld [vmem:[#allocation3 + $0x298] sm:$0xff] }
  0x33   :  { %319 = vadd.xlane.f32.xlu0 %v318_v43  ;;  %v324_v61 = vadd.f32 %v323_v50, %v219_v38  ;;  %v232_v4 = vmul.f32 %v500_v14, %v122_v51  ;;  %v337_v9 = vadd.f32 %v336_v58, %v230_v41  ;;  %v243_v11 = vmul.f32 %v498_v13, %v133_v52 }
  0x34   :  { %333 = vadd.xlane.f32.xlu2 %v332_v56  ;;  %v235_v15 = vmul.f32 %v494_v7, %v125_v55  ;;  %v350_v17 = vadd.f32 %v349_v62, %v241_v54  ;;  %v236_v18 = vmul.f32 %v496_v8, %v126_v60  ;;  %v342_v19 = vadd.f32 %v234_v0, %v233_v63 }
  0x35   :  { %v325_v16 = vadd.f32 %v324_v61, %v220_v49  ;;  %v338_v21 = vadd.f32 %v337_v9, %v231_v57  ;;  %v245_v23 = vmul.f32 %v490_v5, %v135_v1  ;;  %v246_v24 = vmul.f32 %v492_v6, %v136_v2 }
  0x36   :  { %v247_v25 = vmul.f32 %v494_v7, %v137_v3  ;;  %v244_v26 = vmul.f32 %v500_v14, %v134_v10  ;;  %v351_v27 = vadd.f32 %v350_v17, %v242_v59  ;;  %v237_v28 = vmul.f32 %v498_v13, %v127_v12 }
  0x37   :  { %326 = vadd.xlane.f32.xlu1 %v325_v16  ;;  %v343_v30 = vadd.f32 %v342_v19, %v235_v15  ;;  %v339_v32 = vadd.f32 %v338_v21, %v232_v4  ;;  %v248_v33 = vmul.f32 %v496_v8, %v138_v20  ;;  %v356_v34 = vadd.f32 %v246_v24, %v245_v23 }
  0x38   :  { %v352_v29 = vadd.f32 %v351_v27, %v243_v11  ;;  %v238_v35 = vmul.f32 %v500_v14, %v128_v22  ;;  %v249_v6 = vmul.f32 %v498_v13, %v139_v31  ;;  %v250_v39 = vmul.f32 %v500_v14, %v140_v36 }
  0x39   :  { %v344_v5 = vadd.f32 %v343_v30, %v236_v18  ;;  %v357_v7 = vadd.f32 %v356_v34, %v247_v25  ;;  %v364_v43 = vstv %s667_s2 }
  0x3a   :  { %v353_v37 = vadd.f32 %v352_v29, %v244_v26 }
  0x3b   :  { %340 = vadd.xlane.f32.xlu0 %v339_v32  ;;  %v345_v38 = vadd.f32 %v344_v5, %v237_v28  ;;  %v358_v40 = vadd.f32 %v357_v7, %v248_v33 }
  0x3c   :  { %354 = vadd.xlane.f32.xlu2 %v353_v37 }
  0x3d   :  { %v346_v41 = vadd.f32 %v345_v38, %v238_v35  ;;  %v359_v42 = vadd.f32 %v358_v40, %v249_v6 }
  0x3f   :  { %347 = vadd.xlane.f32.xlu1 %v346_v41  ;;  %v360_v8 = vadd.f32 %v359_v42, %v250_v39 }
  0x43   :  { %361 = vadd.xlane.f32.xlu0 %v360_v8 }
  0x8e   :  { %v257_v44 = vpop.xlane.xlu0 %256 }
  0x8f   :  { %v365_v13 = vadd.f32 %v364_v43, %v257_v44  ;;  %v285_v45 = vpop.xlane.xlu2 %284 }
  0x90   :  { %v369_v46 = vadd.f32 %v364_v43, %v285_v45 }
  0x91   :  { %382 = vst.msk [vmem:[%s668_s3] sm:$0xff] %vm381_vm0, %v365_v13  ;;  %v271_v14 = vpop.xlane.xlu1 %270 }
  0x92   :  { %386 = vst.msk [vmem:[%s668_s3 + $0x20] sm:$0xff] %vm381_vm0, %v369_v46  ;;  %v367_v47 = vadd.f32 %v364_v43, %v271_v14 }
  0x94   :  { %384 = vst.msk [vmem:[%s668_s3 + $0x10] sm:$0xff] %vm381_vm0, %v367_v47 }
  0x96   :  { %v264_v48 = vpop.xlane.xlu0 %263 }
  0x97   :  { %v366_v49 = vadd.f32 %v364_v43, %v264_v48  ;;  %v292_v50 = vpop.xlane.xlu2 %291 }
  0x98   :  { %v370_v51 = vadd.f32 %v364_v43, %v292_v50 }
  0x99   :  { %383 = vst.msk [vmem:[%s668_s3 + $0x8] sm:$0xff] %vm381_vm0, %v366_v49 }
  0x9a   :  { %387 = vst.msk [vmem:[%s668_s3 + $0x28] sm:$0xff] %vm381_vm0, %v370_v51  ;;  %v278_v52 = vpop.xlane.xlu1 %277 }
  0x9b   :  { %v368_v53 = vadd.f32 %v364_v43, %v278_v52 }
  0x9d   :  { %385 = vst.msk [vmem:[%s668_s3 + $0x18] sm:$0xff] %vm381_vm0, %v368_v53 }
  0x9e   :  { %v299_v54 = vpop.xlane.xlu0 %298 }
  0x9f   :  { %v371_v55 = vadd.f32 %v364_v43, %v299_v54  ;;  %v313_v56 = vpop.xlane.xlu2 %312 }
  0xa0   :  { %v373_v57 = vadd.f32 %v364_v43, %v313_v56 }
  0xa1   :  { %388 = vst.msk [vmem:[%s668_s3 + $0x30] sm:$0xff] %vm381_vm0, %v371_v55 }
  0xa2   :  { %390 = vst.msk [vmem:[%s668_s3 + $0x40] sm:$0xff] %vm381_vm0, %v373_v57  ;;  %v306_v58 = vpop.xlane.xlu1 %305 }
  0xa3   :  { %v372_v59 = vadd.f32 %v364_v43, %v306_v58 }
  0xa5   :  { %389 = vst.msk [vmem:[%s668_s3 + $0x38] sm:$0xff] %vm381_vm0, %v372_v59 }
  0xa6   :  { %v320_v60 = vpop.xlane.xlu0 %319 }
  0xa7   :  { %v374_v61 = vadd.f32 %v364_v43, %v320_v60  ;;  %v334_v62 = vpop.xlane.xlu2 %333 }
  0xa8   :  { %v376_v63 = vadd.f32 %v364_v43, %v334_v62 }
  0xa9   :  { %391 = vst.msk [vmem:[%s668_s3 + $0x48] sm:$0xff] %vm381_vm0, %v374_v61 }
  0xaa   :  { %393 = vst.msk [vmem:[%s668_s3 + $0x58] sm:$0xff] %vm381_vm0, %v376_v63  ;;  %v327_v0 = vpop.xlane.xlu1 %326 }
  0xab   :  { %v375_v1 = vadd.f32 %v364_v43, %v327_v0 }
  0xad   :  { %392 = vst.msk [vmem:[%s668_s3 + $0x50] sm:$0xff] %vm381_vm0, %v375_v1 }
  0xae   :  { %v341_v2 = vpop.xlane.xlu0 %340 }
  0xaf   :  { %v377_v3 = vadd.f32 %v364_v43, %v341_v2  ;;  %v355_v4 = vpop.xlane.xlu2 %354 }
  0xb0   :  { %v379_v9 = vadd.f32 %v364_v43, %v355_v4 }
  0xb1   :  { %394 = vst.msk [vmem:[%s668_s3 + $0x60] sm:$0xff] %vm381_vm0, %v377_v3 }
  0xb2   :  { %v348_v10 = vpop.xlane.xlu1 %347  ;;  %396 = vst.msk [vmem:[%s668_s3 + $0x70] sm:$0xff] %vm381_vm0, %v379_v9 }
  0xb3   :  { %v378_v11 = vadd.f32 %v364_v43, %v348_v10 }
  0xb5   :  { %395 = vst.msk [vmem:[%s668_s3 + $0x68] sm:$0xff] %vm381_vm0, %v378_v11 }
  0xb6   :  { %v362_v12 = vpop.xlane.xlu0 %361 }
  0xb7   :  { %v380_v15 = vadd.f32 %v364_v43, %v362_v12 }
  0xb9   :  { %397 = vst.msk [vmem:[%s668_s3 + $0x78] sm:$0xff] %vm381_vm0, %v380_v15 }
  0xba   :  { %402 = vsyncpa [#allocation4], 1 }
  0xbb   :  { %403 = vsyncpa [#allocation6], 1 }

</bundles_post_ra>
